<compile_context>
chip_gen: v7x
topology: tpu7x:2x2x1
jax: 0.10.0
libtpu: 0.0.40
codegen_flags: <defaults>
</compile_context>

<pallas_src>
import functools

import numpy as np
import jax
import jax.numpy as jnp
from jax.experimental import pallas as pl
from jax.experimental.pallas import tpu as pltpu


def _point_sim_kernel(s_ref, vp_ref, w1_ref, b1_ref, w2_ref, b2_ref,
                      w3_ref, b3_ref, out_ref, *, bb, metric, slope):
    """Processes `bb` batch elements per grid step, channels-first.

    s_ref  : [N, N*N]      selector, S[k, i*N+j] = d(k,i) - d(k,j)
    vp_ref : [bb, D, N]    node features, channels-first
    w1_ref : [H1, D]       conv1 weight with BN1 scale folded in
    b1_ref : [H1, 1]       folded BN1 bias (sublane column, broadcast on lanes)
    w2_ref : [H2, H1]      conv2 weight with BN2 scale folded in
    b2_ref : [H2, 1]       folded BN2 bias
    w3_ref : [1, H2]       conv3 weight row
    b3_ref : [1]           conv3 bias (SMEM scalar)
    out_ref: [bb, 2, N*N]  row 0 = sigmoid(point_sim_transform), row 1 = -sum_d sim
    """
    f32 = jnp.float32
    S = s_ref[...]
    w1 = w1_ref[...]
    b1 = b1_ref[...]
    w2 = w2_ref[...]
    b2 = b2_ref[...]
    w3 = w3_ref[...]
    b3 = b3_ref[0]

    for b in range(bb):                       # static unroll over the batch block
        vpT = vp_ref[b]                                        # [D, N]
        # All N*N pairwise differences in a single MXU op; column p = i*N + j
        # holds vp[i] - vp[j].  Result is already lane-dense.
        diffT = jnp.dot(vpT, S, preferred_element_type=f32)    # [D, N*N]
        if metric == "l2":
            simT = diffT * diffT
        else:                                                  # "l1"
            simT = jnp.abs(diffT)

        # Node similarity: sublane reduce over D -> lane-dense [1, N*N] row.
        ns_row = -jnp.sum(simT, axis=0, keepdims=True)

        # 1x1-conv stack as a channels-first matmul chain (pairs stay on lanes).
        h1 = jnp.dot(w1, simT, preferred_element_type=f32) + b1     # [H1, N*N]
        h1 = jnp.where(h1 >= 0, h1, slope * h1)                     # LeakyReLU
        h2 = jnp.dot(w2, h1, preferred_element_type=f32) + b2       # [H2, N*N]
        h2 = jnp.where(h2 >= 0, h2, slope * h2)
        o = jnp.dot(w3, h2, preferred_element_type=f32) + b3        # [1, N*N]
        ep_row = jax.nn.sigmoid(o)

        # Single lane-dense output tile per batch element (ep row, ns row).
        out_ref[b, 0:1, :] = ep_row
        out_ref[b, 1:2, :] = ns_row


def _build_selector(n):
    """S[k, i*n + j] = delta(k, i) - delta(k, j), shape [n, n*n]."""
    eye = np.eye(n, dtype=np.float32)
    ones = np.ones((1, n), dtype=np.float32)
    return jnp.asarray(np.kron(eye, ones) - np.kron(ones, eye))


def _pick_batch_block(b):
    """Batch elements fused per grid step.

    Keeps >= 2 parallel grid steps (feeds both v7x TensorCores) while fusing
    several batch elements per step to amortize the ~0.35us fixed per-step
    cost on single-core v5e/v6e.  In-kernel unroll capped at 8.
    """
    for cand in (8, 4, 2):
        if b % cand == 0 and b // cand >= 2:
            return cand
    return 1


def _post_process(ep_sig, ep_last_gen, n):
    """Exact mirror of the PyTorch post-processing (diag mask + L1 renorm)."""
    diag = jnp.eye(n, dtype=ep_last_gen.dtype)
    diagonal_mask = 1.0 - diag[None]
    ep_last_m = ep_last_gen * diagonal_mask
    ep_last_sum = jnp.sum(ep_last_m, axis=-1, keepdims=True)

    ep_ij = ep_sig * ep_last_m
    l1 = jnp.sum(jnp.abs(ep_ij), axis=-1, keepdims=True)      # F.normalize p=1
    ep_ij = ep_ij / jnp.maximum(l1, 1e-12)
    ep_ij = ep_ij * ep_last_sum

    ep_ij = ep_ij + diag[None] + 1e-6
    ep_ij = ep_ij / jnp.sum(ep_ij, axis=2, keepdims=True)
    return ep_ij


def point_similarity_pre_forward(vp_last_gen, ep_last_gen, params,
                                 distance_metric="l2"):
    """JAX/Pallas equivalent of PointSimilarity_Pre.forward (inference)."""
    if distance_metric not in ("l2", "l1"):
        raise ValueError(f"unknown distance metric: {distance_metric}")

    B, N, D = vp_last_gen.shape
    NN = N * N
    H1 = params["w1"].shape[0]          # 2 * base_c
    H2 = params["w2"].shape[0]          # base_c
    bb = _pick_batch_block(B)

    # Channels-first node features: pure layout plumbing so the kernel never
    # needs an in-kernel transpose.
    vp_cf = jnp.transpose(vp_last_gen, (0, 2, 1)).astype(jnp.float32)  # [B, D, N]
    sel = _build_selector(N)                                           # [N, N*N]

    kernel = functools.partial(_point_sim_kernel, bb=bb,
                               metric=distance_metric, slope=0.01)

    out = pl.pallas_call(
        kernel,
        out_shape=jax.ShapeDtypeStruct((B, 2, NN), jnp.float32),
        grid_spec=pltpu.PrefetchScalarGridSpec(
            num_scalar_prefetch=0,
            grid=(B // bb,),
            in_specs=[
                pl.BlockSpec((N, NN), lambda b: (0, 0)),            # selector
                pl.BlockSpec((bb, D, N), lambda b: (b, 0, 0)),      # vp (CF)
                pl.BlockSpec((H1, D), lambda b: (0, 0)),            # w1 (BN folded)
                pl.BlockSpec((H1, 1), lambda b: (0, 0)),            # b1
                pl.BlockSpec((H2, H1), lambda b: (0, 0)),           # w2 (BN folded)
                pl.BlockSpec((H2, 1), lambda b: (0, 0)),            # b2
                pl.BlockSpec((1, H2), lambda b: (0, 0)),            # w3
                pl.BlockSpec(memory_space=pltpu.MemorySpace.SMEM),  # b3 scalar
            ],
            out_specs=pl.BlockSpec((bb, 2, NN), lambda b: (b, 0, 0)),
        ),
        compiler_params=pltpu.CompilerParams(
            dimension_semantics=("parallel",)),   # both v7x TCs used when B>=2
    )(sel, vp_cf, params["w1"], params["b1"], params["w2"], params["b2"],
      params["w3"], params["b3"])

    ep_sig = out[:, 0, :].reshape(B, N, N)
    node_similarity_l2 = out[:, 1, :].reshape(B, N, N)

    ep_ij = _post_process(ep_sig, ep_last_gen, N)
    return ep_ij, node_similarity_l2


def _reference_forward(vp, ep_last, params, distance_metric):
    """Pure-JAX reference mirroring the PyTorch module (for validation)."""
    vp_i = vp[:, :, None, :]
    vp_j = vp[:, None, :, :]
    if distance_metric == "l2":
        sim = (vp_i - vp_j) ** 2
    else:
        sim = jnp.abs(vp_i - vp_j)

    hp = jax.lax.Precision.HIGHEST
    b1 = params["b1"][:, 0]
    b2 = params["b2"][:, 0]
    w3 = params["w3"][0]
    b3 = params["b3"][0]

    h1 = jnp.einsum("bijd,hd->bijh", sim, params["w1"], precision=hp) + b1
    h1 = jnp.where(h1 >= 0, h1, 0.01 * h1)
    h2 = jnp.einsum("bijh,ch->bijc", h1, params["w2"], precision=hp) + b2
    h2 = jnp.where(h2 >= 0, h2, 0.01 * h2)
    o = jnp.sum(h2 * w3, axis=-1) + b3
    ep_sig = jax.nn.sigmoid(o)                    # symmetric, so (i,j) order ok
    node_sim = -jnp.sum(sim, axis=-1)

    ep_ij = _post_process(ep_sig, ep_last, vp.shape[1])
    return ep_ij, node_sim


def init_params(key, in_c, base_c):
    """Deterministic synthetic parameters; BatchNorm folded INTO the weights."""
    h1, h2 = 2 * base_c, base_c
    ks = jax.random.split(key, 12)
    eps = 1e-5

    w1 = 0.1 * jax.random.normal(ks[0], (h1, in_c), jnp.float32)   # [out, in]
    g1 = 1.0 + 0.1 * jax.random.normal(ks[1], (h1,), jnp.float32)
    be1 = 0.1 * jax.random.normal(ks[2], (h1,), jnp.float32)
    mu1 = 0.1 * jax.random.normal(ks[3], (h1,), jnp.float32)
    var1 = jnp.abs(jax.random.normal(ks[4], (h1,), jnp.float32)) + 0.5
    s1 = g1 / jnp.sqrt(var1 + eps)
    b1 = be1 - mu1 * s1

    w2 = 0.1 * jax.random.normal(ks[5], (h2, h1), jnp.float32)
    g2 = 1.0 + 0.1 * jax.random.normal(ks[6], (h2,), jnp.float32)
    be2 = 0.1 * jax.random.normal(ks[7], (h2,), jnp.float32)
    mu2 = 0.1 * jax.random.normal(ks[8], (h2,), jnp.float32)
    var2 = jnp.abs(jax.random.normal(ks[9], (h2,), jnp.float32)) + 0.5
    s2 = g2 / jnp.sqrt(var2 + eps)
    b2 = be2 - mu2 * s2

    w3 = 0.1 * jax.random.normal(ks[10], (1, h2), jnp.float32)
    b3 = 0.1 * jax.random.normal(ks[11], (1,), jnp.float32)

    return {
        "w1": w1 * s1[:, None],          # [2*base_c, in_c]   conv1 * BN1 scale
        "b1": b1[:, None],               # [2*base_c, 1]      folded BN1 bias
        "w2": w2 * s2[:, None],          # [base_c, 2*base_c] conv2 * BN2 scale
        "b2": b2[:, None],               # [base_c, 1]        folded BN2 bias
        "w3": w3,                        # [1, base_c]        conv3 weight row
        "b3": b3,                        # [1]                conv3 bias (SMEM)
    }


if __name__ == "__main__":
    B, N, in_c, base_c = 2, 16, 8, 16    # small shapes consistent with the module

    key = jax.random.PRNGKey(0)
    k_vp, k_ep, k_par = jax.random.split(key, 3)

    vp_last_gen = jax.random.normal(k_vp, (B, N, in_c), jnp.float32)
    ep_last_gen = jax.random.uniform(k_ep, (B, N, N), jnp.float32)
    params = init_params(k_par, in_c, base_c)

    fwd = jax.jit(functools.partial(point_similarity_pre_forward,
                                    distance_metric="l2"))
    ep_ij, node_similarity_l2 = fwd(vp_last_gen, ep_last_gen, params)
    jax.block_until_ready((ep_ij, node_similarity_l2))

    assert ep_ij.shape == (B, N, N)
    assert node_similarity_l2.shape == (B, N, N)
    assert bool(jnp.all(jnp.isfinite(ep_ij)))
    assert bool(jnp.all(jnp.isfinite(node_similarity_l2)))
    # final edge features are row-normalized
    assert bool(jnp.allclose(jnp.sum(ep_ij, axis=2), 1.0, atol=1e-5))

    # compare against a pure-JAX reference of the full forward pass
    ep_ref, ns_ref = _reference_forward(vp_last_gen, ep_last_gen, params, "l2")
    assert bool(jnp.allclose(ep_ij, ep_ref, rtol=1e-3, atol=1e-3))
    assert bool(jnp.allclose(node_similarity_l2, ns_ref, rtol=1e-3, atol=1e-3))

    print("KERNEL_OK")
</pallas_src>

<mosaic_0001>
module attributes {stable_mosaic.version = 11 : i64} {
  func.func @_point_sim_kernel(%arg0: i32, %arg1: memref<16x256xf32, #tpu.memory_space<vmem>>, %arg2: memref<1x8x16xf32, #tpu.memory_space<vmem>>, %arg3: memref<32x8xf32, #tpu.memory_space<vmem>>, %arg4: memref<32x1xf32, #tpu.memory_space<vmem>>, %arg5: memref<16x32xf32, #tpu.memory_space<vmem>>, %arg6: memref<16x1xf32, #tpu.memory_space<vmem>>, %arg7: memref<1x16xf32, #tpu.memory_space<vmem>>, %arg8: memref<1xf32, #tpu.memory_space<smem>>, %arg9: memref<1x2x256xf32, #tpu.memory_space<vmem>>) attributes {dimension_semantics = [#tpu.dimension_semantics<parallel>], iteration_bounds = array<i64: 2>, scalar_prefetch = 0 : i64, scratch_operands = 0 : i64, tpu.core_type = #tpu.core_type<tc>, window_params = [{pipeline_mode = #tpu.pipeline_mode<synchronous>, transform_indices = @transform_0, window_bounds = array<i64: 16, 256>}, {transform_indices = @transform_1, window_bounds = array<i64: 1, 8, 16>}, {pipeline_mode = #tpu.pipeline_mode<synchronous>, transform_indices = @transform_2, window_bounds = array<i64: 32, 8>}, {pipeline_mode = #tpu.pipeline_mode<synchronous>, transform_indices = @transform_3, window_bounds = array<i64: 32, 1>}, {pipeline_mode = #tpu.pipeline_mode<synchronous>, transform_indices = @transform_4, window_bounds = array<i64: 16, 32>}, {pipeline_mode = #tpu.pipeline_mode<synchronous>, transform_indices = @transform_5, window_bounds = array<i64: 16, 1>}, {pipeline_mode = #tpu.pipeline_mode<synchronous>, transform_indices = @transform_6, window_bounds = array<i64: 1, 16>}, {transform_indices = @transform_7, window_bounds = array<i64: 1>}, {transform_indices = @transform_8, window_bounds = array<i64: 1, 2, 256>}]} {
    %c0 = arith.constant 0 : index
    %c0_0 = arith.constant 0 : index
    %0 = vector.load %arg1[%c0, %c0_0] : memref<16x256xf32, #tpu.memory_space<vmem>>, vector<16x256xf32>
    %c0_1 = arith.constant 0 : index
    %c0_2 = arith.constant 0 : index
    %1 = vector.load %arg3[%c0_1, %c0_2] : memref<32x8xf32, #tpu.memory_space<vmem>>, vector<32x8xf32>
    %c0_3 = arith.constant 0 : index
    %c0_4 = arith.constant 0 : index
    %2 = vector.load %arg4[%c0_3, %c0_4] : memref<32x1xf32, #tpu.memory_space<vmem>>, vector<32x1xf32>
    %c0_5 = arith.constant 0 : index
    %c0_6 = arith.constant 0 : index
    %3 = vector.load %arg5[%c0_5, %c0_6] : memref<16x32xf32, #tpu.memory_space<vmem>>, vector<16x32xf32>
    %c0_7 = arith.constant 0 : index
    %c0_8 = arith.constant 0 : index
    %4 = vector.load %arg6[%c0_7, %c0_8] : memref<16x1xf32, #tpu.memory_space<vmem>>, vector<16x1xf32>
    %c0_9 = arith.constant 0 : index
    %c0_10 = arith.constant 0 : index
    %5 = vector.load %arg7[%c0_9, %c0_10] : memref<1x16xf32, #tpu.memory_space<vmem>>, vector<1x16xf32>
    %c0_11 = arith.constant 0 : index
    %6 = memref.load %arg8[%c0_11] : memref<1xf32, #tpu.memory_space<smem>>
    %c0_12 = arith.constant 0 : index
    %c0_13 = arith.constant 0 : index
    %c0_14 = arith.constant 0 : index
    %7 = vector.load %arg2[%c0_12, %c0_13, %c0_14] : memref<1x8x16xf32, #tpu.memory_space<vmem>>, vector<1x8x16xf32>
    %8 = vector.shape_cast %7 : vector<1x8x16xf32> to vector<8x16xf32>
    %cst = arith.constant dense<0.000000e+00> : vector<8x256xf32>
    %9 = tpu.matmul %8, %0, %cst {dimension_numbers = #tpu.dot_dimension_numbers<[1], [0], [0], [1], [0, 0, 1, 1], [], []>} : vector<8x16xf32>, vector<16x256xf32>, vector<8x256xf32> -> vector<8x256xf32>
    %10 = arith.mulf %9, %9 : vector<8x256xf32>
    %cst_15 = arith.constant dense<0.000000e+00> : vector<256xf32>
    %11 = vector.multi_reduction <add>, %10, %cst_15 [0] : vector<8x256xf32> to vector<256xf32>
    %12 = vector.shape_cast %11 : vector<256xf32> to vector<1x256xf32>
    %cst_16 = arith.constant 0.000000e+00 : f32
    %13 = vector.broadcast %cst_16 : f32 to vector<1x256xf32>
    %14 = arith.subf %13, %12 : vector<1x256xf32>
    %cst_17 = arith.constant dense<0.000000e+00> : vector<32x256xf32>
    %15 = tpu.matmul %1, %10, %cst_17 {dimension_numbers = #tpu.dot_dimension_numbers<[1], [0], [0], [1], [0, 0, 1, 1], [], []>} : vector<32x8xf32>, vector<8x256xf32>, vector<32x256xf32> -> vector<32x256xf32>
    %16 = vector.broadcast %2 : vector<32x1xf32> to vector<32x256xf32>
    %17 = arith.addf %15, %16 : vector<32x256xf32>
    %cst_18 = arith.constant 0.000000e+00 : f32
    %18 = vector.broadcast %cst_18 : f32 to vector<32x256xf32>
    %19 = arith.cmpf oge, %17, %18 : vector<32x256xf32>
    %cst_19 = arith.constant 0.00999999977 : f32
    %20 = vector.broadcast %cst_19 : f32 to vector<32x256xf32>
    %21 = arith.mulf %20, %17 : vector<32x256xf32>
    %22 = arith.select %19, %17, %21 : vector<32x256xi1>, vector<32x256xf32>
    %cst_20 = arith.constant dense<0.000000e+00> : vector<16x256xf32>
    %23 = tpu.matmul %3, %22, %cst_20 {dimension_numbers = #tpu.dot_dimension_numbers<[1], [0], [0], [1], [0, 0, 1, 1], [], []>} : vector<16x32xf32>, vector<32x256xf32>, vector<16x256xf32> -> vector<16x256xf32>
    %24 = vector.broadcast %4 : vector<16x1xf32> to vector<16x256xf32>
    %25 = arith.addf %23, %24 : vector<16x256xf32>
    %cst_21 = arith.constant 0.000000e+00 : f32
    %26 = vector.broadcast %cst_21 : f32 to vector<16x256xf32>
    %27 = arith.cmpf oge, %25, %26 : vector<16x256xf32>
    %cst_22 = arith.constant 0.00999999977 : f32
    %28 = vector.broadcast %cst_22 : f32 to vector<16x256xf32>
    %29 = arith.mulf %28, %25 : vector<16x256xf32>
    %30 = arith.select %27, %25, %29 : vector<16x256xi1>, vector<16x256xf32>
    %cst_23 = arith.constant dense<0.000000e+00> : vector<1x256xf32>
    %31 = tpu.matmul %5, %30, %cst_23 {dimension_numbers = #tpu.dot_dimension_numbers<[1], [0], [0], [1], [0, 0, 1, 1], [], []>} : vector<1x16xf32>, vector<16x256xf32>, vector<1x256xf32> -> vector<1x256xf32>
    %32 = vector.broadcast %6 : f32 to vector<1x256xf32>
    %33 = arith.addf %31, %32 : vector<1x256xf32>
    %34 = arith.negf %33 : vector<1x256xf32>
    %35 = math.exp %34 : vector<1x256xf32>
    %cst_24 = arith.constant 1.000000e+00 : f32
    %36 = vector.broadcast %cst_24 : f32 to vector<1x256xf32>
    %37 = arith.addf %36, %35 : vector<1x256xf32>
    %38 = arith.divf %36, %37 : vector<1x256xf32>
    %c0_25 = arith.constant 0 : index
    %c0_26 = arith.constant 0 : index
    %c0_27 = arith.constant 0 : index
    %39 = vector.load %arg9[%c0_25, %c0_26, %c0_27] : memref<1x2x256xf32, #tpu.memory_space<vmem>>, vector<1x1x256xf32>
    %40 = vector.shape_cast %39 : vector<1x1x256xf32> to vector<1x256xf32>
    %41 = vector.shape_cast %38 : vector<1x256xf32> to vector<1x1x256xf32>
    tpu.vector_store %arg9[%c0_25, %c0_26, %c0_27], %41 {strides = array<i32>} : memref<1x2x256xf32, #tpu.memory_space<vmem>>, vector<1x1x256xf32>,
    %c0_28 = arith.constant 0 : index
    %c1 = arith.constant 1 : index
    %c0_29 = arith.constant 0 : index
    %42 = vector.load %arg9[%c0_28, %c1, %c0_29] : memref<1x2x256xf32, #tpu.memory_space<vmem>>, vector<1x1x256xf32>
    %43 = vector.shape_cast %42 : vector<1x1x256xf32> to vector<1x256xf32>
    %44 = vector.shape_cast %14 : vector<1x256xf32> to vector<1x1x256xf32>
    tpu.vector_store %arg9[%c0_28, %c1, %c0_29], %44 {strides = array<i32>} : memref<1x2x256xf32, #tpu.memory_space<vmem>>, vector<1x1x256xf32>,
    return
  }
  func.func @transform_0(%arg0: i32) -> (i32, i32) {
    %c0_i32 = arith.constant 0 : i32
    %c0_i32_0 = arith.constant 0 : i32
    %c0_i32_1 = arith.constant 0 : i32
    return %c0_i32, %c0_i32_0 : i32, i32
  }
  func.func @transform_1(%arg0: i32) -> (i32, i32, i32) {
    %c0_i32 = arith.constant 0 : i32
    %c0_i32_0 = arith.constant 0 : i32
    %c0_i32_1 = arith.constant 0 : i32
    return %arg0, %c0_i32, %c0_i32_0 : i32, i32, i32
  }
  func.func @transform_2(%arg0: i32) -> (i32, i32) {
    %c0_i32 = arith.constant 0 : i32
    %c0_i32_0 = arith.constant 0 : i32
    %c0_i32_1 = arith.constant 0 : i32
    return %c0_i32, %c0_i32_0 : i32, i32
  }
  func.func @transform_3(%arg0: i32) -> (i32, i32) {
    %c0_i32 = arith.constant 0 : i32
    %c0_i32_0 = arith.constant 0 : i32
    %c0_i32_1 = arith.constant 0 : i32
    return %c0_i32, %c0_i32_0 : i32, i32
  }
  func.func @transform_4(%arg0: i32) -> (i32, i32) {
    %c0_i32 = arith.constant 0 : i32
    %c0_i32_0 = arith.constant 0 : i32
    %c0_i32_1 = arith.constant 0 : i32
    return %c0_i32, %c0_i32_0 : i32, i32
  }
  func.func @transform_5(%arg0: i32) -> (i32, i32) {
    %c0_i32 = arith.constant 0 : i32
    %c0_i32_0 = arith.constant 0 : i32
    %c0_i32_1 = arith.constant 0 : i32
    return %c0_i32, %c0_i32_0 : i32, i32
  }
  func.func @transform_6(%arg0: i32) -> (i32, i32) {
    %c0_i32 = arith.constant 0 : i32
    %c0_i32_0 = arith.constant 0 : i32
    %c0_i32_1 = arith.constant 0 : i32
    return %c0_i32, %c0_i32_0 : i32, i32
  }
  func.func @transform_7(%arg0: i32) -> i32 {
    %c0_i32 = arith.constant 0 : i32
    %c0_i32_0 = arith.constant 0 : i32
    return %c0_i32 : i32
  }
  func.func @transform_8(%arg0: i32) -> (i32, i32, i32) {
    %c0_i32 = arith.constant 0 : i32
    %c0_i32_0 = arith.constant 0 : i32
    %c0_i32_1 = arith.constant 0 : i32
    return %arg0, %c0_i32, %c0_i32_0 : i32, i32, i32
  }
}

</mosaic_0001>

<bundles_post_ra>
// kernel: squeeze.2
= control target key start
LH: loop header
LB: loop body
LE: loop exit
PB: predicated region body
PF: predicated region fallthrough
CT: control target
= control target key end

     0   :  { %vm11_vm0 = vcmask 130048   ;;  %s77_s10 = smov 80   ;;  %s78_s15 = smov 96   ;;  %s135_s0 = inlined_call_operand.vmem [shape: f32[2,256], index: 0, kind: input, shape index: {}]   ;;  %s136_s1 = inlined_call_operand.vmem [shape: f32[2,16,16], index: 1, kind: output, shape index: {}]  }
   0x1   :  { %v60_v0 = vld [vmem:[%s135_s0 + $0x2] sm:$0x3]  ;;  %v8_v1 = vld [vmem:[%s135_s0] sm:$0x3]  ;;  %s76_s0 = smov 112   ;;  %s79_s16 = smov 64  }
   0x2   :  { %7 = vst [vmem:[#allocation0 + $0x8] sm:$0x3] %v60_v0  ;;  %9 = vst [vmem:[#allocation0] sm:$0x3] %v8_v1  ;;  %s80_s17 = smov 48   ;;  %s81_s18 = smov 32  }
   0x3   :  { %s82_s19 = smov 16  }
   0x9   :  { %v18_v2 = vld.sshfl [vmem:[#allocation0] sm:$0xff pattern:$0x99999180]  }
   0xa   :  { %v10_v3 = vld [vmem:[#allocation0] sm:$0x3]   ;;  %19 = vrot.lane.b32.xlu0 %v18_v2, %s76_s0  ;;  %31 = vrot.lane.b32.xlu1 %v18_v2, %s77_s10  ;;  %v14_v4 = vld [vmem:[#allocation0 + $0x8] sm:$0x3]  }
   0xb   :  { %12 = vst.msk [vmem:[%s136_s1] ss:$16 sm:$0x3] %vm11_vm0, %v10_v3   ;;  %61 = vst.msk [vmem:[%s136_s1 + $0x8] ss:$16 sm:$0x3] %vm11_vm0, %v14_v4  }
   0xe   :  { %25 = vrot.lane.b32.xlu0 %v18_v2, %s78_s15  ;;  %37 = vrot.lane.b32.xlu1 %v18_v2, %s79_s16 }
  0x12   :  { %43 = vrot.lane.b32.xlu0 %v18_v2, %s80_s17  ;;  %49 = vrot.lane.b32.xlu1 %v18_v2, %s81_s18 }
  0x16   :  { %55 = vrot.lane.b32.xlu0 %v18_v2, %s82_s19 }
  0x7c   :  { %v20_v5 = vpop.permute.xlu0 %19   ;;  %v32_v6 = vpop.permute.xlu1 %31  }
  0x7d   :  { %62 = vst.msk [vmem:[%s136_s1 + $0x1] ss:$8 sm:$0xf] %vm11_vm0, %v20_v5   ;;  %64 = vst.msk [vmem:[%s136_s1 + $0x3] ss:$8 sm:$0xf] %vm11_vm0, %v32_v6  }
  0x80   :  { %v26_v7 = vpop.permute.xlu0 %25   ;;  %v38_v8 = vpop.permute.xlu1 %37  }
  0x81   :  { %63 = vst.msk [vmem:[%s136_s1 + $0x2] ss:$8 sm:$0xf] %vm11_vm0, %v26_v7   ;;  %65 = vst.msk [vmem:[%s136_s1 + $0x4] ss:$8 sm:$0xf] %vm11_vm0, %v38_v8  }
  0x84   :  { %v44_v9 = vpop.permute.xlu0 %43   ;;  %v50_v10 = vpop.permute.xlu1 %49  }
  0x85   :  { %66 = vst.msk [vmem:[%s136_s1 + $0x5] ss:$8 sm:$0xf] %vm11_vm0, %v44_v9   ;;  %67 = vst.msk [vmem:[%s136_s1 + $0x6] ss:$8 sm:$0xf] %vm11_vm0, %v50_v10  }
  0x88   :  { %v56_v11 = vpop.permute.xlu0 %55  }
  0x89   :  { %68 = vst.msk [vmem:[%s136_s1 + $0x7] ss:$8 sm:$0xf] %vm11_vm0, %v56_v11  }

// kernel: squeeze.3
= control target key start
LH: loop header
LB: loop body
LE: loop exit
PB: predicated region body
PF: predicated region fallthrough
CT: control target
= control target key end

     0   :  { %s149_s0 = inlined_call_operand.vmem [shape: f32[2,256], index: 0, kind: input, shape index: {}]   ;;  %s150_s1 = inlined_call_operand.hbm [shape: f32[2,16,16], index: 1, kind: output, shape index: {}]  }
   0x1   :  { %v71_v0 = vld [vmem:[%s149_s0 + $0x2] sm:$0x3]  ;;  %v9_v1 = vld [vmem:[%s149_s0] sm:$0x3] }
   0x2   :  { %8 = vst [vmem:[#allocation2 + $0x8] sm:$0x3] %v71_v0  ;;  %10 = vst [vmem:[#allocation2] sm:$0x3] %v9_v1 }
   0x3   :  { %2 = vsyncpa [#allocation1], 0  ;;  %vm12_vm0 = vcmask 130048   ;;  %s104_s0 = smov 112   ;;  %s105_s10 = smov 80  }
   0x4   :  { %s106_s11 = smov 96   ;;  %s107_s12 = smov 64  }
   0x5   :  { %s108_s13 = smov 48   ;;  %s109_s14 = smov 32  }
   0x6   :  { %s110_s15 = smov 16   ;;  %s111_s16 = smov [#allocation0]  }
   0x7   :  { %s65_s17 = sshll.u32 %s111_s16, 4  ;;  %s66_s17 = int_to_ptr.vmem [resolvable:$true] %s65_s17 }
   0x8   :  { %s80_s18 = scalar_lea.vmem %s66_s17, 512  ;;  %p85_p1 = scmp.lt.s32.totalorder %s66_s17, %s66_s17 }
   0x9   :  { %v19_v2 = vld.sshfl [vmem:[#allocation2] sm:$0xff pattern:$0x99999180]   ;;  %p81_p0 = scmp.ne.s32.totalorder %s66_s17, %s80_s18  ;;  %p86_p2 = scmp.lt.s32.totalorder %s80_s18, %s80_s18 }
   0xa   :  { %v11_v3 = vld [vmem:[#allocation2] sm:$0x3]   ;;  %20 = vrot.lane.b32.xlu0 %v19_v2, %s104_s0  ;;  %32 = vrot.lane.b32.xlu1 %v19_v2, %s105_s10  ;;  %v15_v4 = vld [vmem:[#allocation2 + $0x8] sm:$0x3]  }
   0xb   :  { %13 = vst.msk [vmem:[#allocation0] ss:$16 sm:$0x3] %vm12_vm0, %v11_v3   ;;  %18 = vst.msk [vmem:[#allocation0 + $0x8] ss:$16 sm:$0x3] %vm12_vm0, %v15_v4   ;;  %p87_p3 = por %p86_p2, %p85_p1 }
   0xd   :  { %p88_p4 = pnand %p87_p3, %p81_p0 }
   0xe   :  { %26 = vrot.lane.b32.xlu0 %v19_v2, %s106_s11  ;;  %38 = vrot.lane.b32.xlu1 %v19_v2, %s107_s12 }
  0x12   :  { %44 = vrot.lane.b32.xlu0 %v19_v2, %s108_s13  ;;  %50 = vrot.lane.b32.xlu1 %v19_v2, %s109_s14 }
  0x16   :  { %56 = vrot.lane.b32.xlu0 %v19_v2, %s110_s15 }
  0x7c   :  { %v21_v5 = vpop.permute.xlu0 %20   ;;  %v33_v6 = vpop.permute.xlu1 %32  }
  0x7d   :  { %24 = vst.msk [vmem:[#allocation0 + $0x1] ss:$8 sm:$0xf] %vm12_vm0, %v21_v5   ;;  %36 = vst.msk [vmem:[#allocation0 + $0x3] ss:$8 sm:$0xf] %vm12_vm0, %v33_v6  }
  0x80   :  { %v27_v7 = vpop.permute.xlu0 %26   ;;  %v39_v8 = vpop.permute.xlu1 %38  }
  0x81   :  { %30 = vst.msk [vmem:[#allocation0 + $0x2] ss:$8 sm:$0xf] %vm12_vm0, %v27_v7   ;;  %42 = vst.msk [vmem:[#allocation0 + $0x4] ss:$8 sm:$0xf] %vm12_vm0, %v39_v8  }
  0x84   :  { %v45_v9 = vpop.permute.xlu0 %44   ;;  %v51_v10 = vpop.permute.xlu1 %50  }
  0x85   :  { %48 = vst.msk [vmem:[#allocation0 + $0x5] ss:$8 sm:$0xf] %vm12_vm0, %v45_v9   ;;  %54 = vst.msk [vmem:[#allocation0 + $0x6] ss:$8 sm:$0xf] %vm12_vm0, %v51_v10  }
  0x88   :  { %v57_v11 = vpop.permute.xlu0 %56  }
  0x89   :  { %60 = vst.msk [vmem:[#allocation0 + $0x7] ss:$8 sm:$0xf] %vm12_vm0, %v57_v11  }
  0x8a   :  { %91 = shalt.err (!%p88_p4)
}
  0x8b   :  { %s92_s21 = scalar_lea.hbm %s150_s1, 512 }
  0x8c   :  { %p93_p5 = scmp.ne.s32.totalorder %s150_s1, %s92_s21  ;;  %p96_p6 = scmp.lt.u32.totalorder %s92_s21, %s150_s1 }
  0x8e   :  { %p98_p7 = pnand %p96_p6, %p93_p5 }
  0x90   :  { %101 = shalt.err (!%p98_p7)
}
  0x91   :  { %68 = dma.vmem_to_hbm [thread:$0]  %s66_s17, 512, %s150_s1, [#allocation1]  }
  0x92   :  { %102 = dma.done.wait [#allocation1], 512  }
  0x93   :  { %103 = vsyncadd [#allocation1], 4294966784 }
  0x94   :  { %70 = vsyncpa [#allocation1], 1 }

// kernel: point_similarity_pre_forward.1
= control target key start
LH: loop header
LB: loop body
LE: loop exit
PB: predicated region body
PF: predicated region fallthrough
CT: control target
= control target key end

     0   :  { %s969_s29 = smov 0   ;;  %s1073_s0 = inlined_call_operand.vmem [shape: f32[16,256], index: 0, kind: input, shape index: {}]   ;;  %s1074_s1 = inlined_call_operand.vmem [shape: f32[2,8,16], index: 1, kind: input, shape index: {}]   ;;  %s1075_s2 = inlined_call_operand.vmem [shape: f32[32,8], index: 2, kind: input, shape index: {}]   ;;  %s1076_s3 = inlined_call_operand.vmem [shape: f32[32,1], index: 3, kind: input, shape index: {}]   ;;  %s1077_s4 = inlined_call_operand.vmem [shape: f32[16,32], index: 4, kind: input, shape index: {}]   ;;  %s1078_s5 = inlined_call_operand.vmem [shape: f32[16,1], index: 5, kind: input, shape index: {}]   ;;  %s1079_s6 = inlined_call_operand.vmem [shape: f32[1,16], index: 6, kind: input, shape index: {}]   ;;  %s1080_s7 = inlined_call_operand.<no memory space> [shape: f32[1], index: 7, kind: input, shape index: {}]   ;;  %s1081_s8 = inlined_call_operand.vmem [shape: f32[2,2,256], index: 8, kind: output, shape index: {}]  }
   0x1   :  { %13 = sst [smem:[#allocation2]] %s1080_s7 }
   0x2 LB: > { %s851_s30 = sadd.s32 4294967295, %s916_s29   ;;  %p855_p0 = scmp.ge.s32.totalorder %s916_s29, 1  ;;  %s916_s29 = sphi %s969_s29, %s19_s29  }
   0x3   : > { %p262_p1 = scmp.lt.s32.totalorder %s916_s29, 3 }
   0x5   : > { %p263_p2 = pnand %p855_p0, %p262_p1 }
   0x6   : > { %v305_v0 = vld [vmem:[%s1073_s0 + $0x8] sm:$0xff] (!%p263_p2)  ;;  %v307_v1 = vld [vmem:[%s1073_s0 + $0x18] sm:$0xff] (!%p263_p2)  ;;  %v304_v2 = vld [vmem:[%s1073_s0] sm:$0xff] (!%p263_p2)  ;;  %p295_p3 = scmp.lt.s32.totalorder (!%p263_p2), %s851_s30, 1  ;;  %v918_v5 = vmov (!%p263_p2), 0.0   ;;  %vm323_vm0 = vcmask (!%p263_p2), 130048   ;;  %v759_v29 = vlaneseq (!%p263_p2) }
   0x7   : > { %266 = sbr.rel (%p263_p2) target bundleno = 947 (0x3b3), region = 52  ;;  %v873_v3 = vpack.c.bf16 (!%p263_p2), %v307_v1, %v305_v0  ;;  %v306_v4 = vld [vmem:[%s1073_s0 + $0x10] sm:$0xff] (!%p263_p2)  ;;  %391 = vmatprep.mubr.f32.mxu0 (!%p263_p2), %v918_v5  ;;  %511 = vmatprep.mubr.f32.mxu1 (!%p263_p2), %v918_v5  ;;  %v312_v8 = vld [vmem:[%s1076_s3] sm:$0xff] (!%p263_p2)  ;;  %v919_v10 = vmov (!%p263_p2), 0   ;;  %v313_v11 = vld [vmem:[%s1076_s3 + $0x8] sm:$0xff] (!%p263_p2)  ;;  %vm434_vm1 = vcmask (!%p263_p2), 64512  }
   0x8   : > { %v875_v6 = vpack.c.bf16 (!%p263_p2), %v306_v4, %v304_v2  ;;  %v314_v9 = vld [vmem:[%s1076_s3 + $0x10] sm:$0xff] (!%p263_p2)  ;;  %900 = vset.pattern.permute.xlu0 (!%p263_p2), %v919_v10  ;;  %901 = vset.pattern.permute.xlu1 (!%p263_p2), %v919_v10  ;;  %v315_v12 = vld [vmem:[%s1076_s3 + $0x18] sm:$0xff] (!%p263_p2)  ;;  %v318_v13 = vld [vmem:[%s1078_s5] sm:$0xff] (!%p263_p2)  ;;  %v920_v27 = vmov (!%p263_p2), 1966171168   ;;  %v760_v36 = vshrl.u32 (!%p263_p2), %v759_v29, 7 }
   0x9   : > { %874 = vmatprep.subr.bf16.mxu0 (!%p263_p2), %v873_v3  ;;  %416 = vperm.xlu0 (!%p263_p2), %900, %v312_v8   ;;  %v319_v14 = vld [vmem:[%s1078_s5 + $0x8] sm:$0xff] (!%p263_p2)  ;;  %v308_v20 = vld [vmem:[%s1075_s2] sm:$0xff] (!%p263_p2)  ;;  %v757_v28 = vunpack.c.l.s4 (!%p263_p2), %v920_v27  ;;  %v310_v33 = vld [vmem:[%s1075_s2 + $0x10] sm:$0xff] (!%p263_p2)  ;;  %vm1046_vm2 = vcmp.lt.s32.totalorder (!%p263_p2), %v759_v29, 256  ;;  %vm570_vm11 = vcmask (!%p263_p2), 261120   ;;  %s321_s28 = sld [smem:[#allocation2]] (!%p263_p2) }
   0xa   : > { %876 = vmatpush1.bf16.msra.mxu0 (!%p263_p2), %v875_v6  ;;  %426 = vperm.xlu1 (!%p263_p2), %901, %v314_v9   ;;  %v309_v25 = vld [vmem:[%s1075_s2 + $0x8] sm:$0xff] (!%p263_p2)  ;;  %v311_v40 = vld [vmem:[%s1075_s2 + $0x18] sm:$0xff] (!%p263_p2) }
   0xb   : > { %v758_v35 = vunpack.c.0.s8 (!%p263_p2), %v757_v28 }
   0xd   : > { %421 = vperm.xlu0 (!%p263_p2), %900, %v313_v11   ;;  %v1035_v42 = vsub.s32 (!%p263_p2), %v758_v35, %v760_v36 }
   0xe   : > { %s1085_s30 = smov (!%p295_p3, %s851_s30), 1  ;;  %431 = vperm.xlu1 %901, %v315_v12  }
   0xf   : > { %s856_s16 = sshll.u32 %s1085_s30, 3 }
  0x10   : > { %s298_s19 = scalar_lea.vmem %s1074_s1, %s856_s16 }
  0x11   : > { %v322_v7 = vld [vmem:[%s298_s19] sm:$0xff]  ;;  %562 = vperm.xlu0 %900, %v318_v13   ;;  %s872_s19 = sshll.u32 %s1085_s30, 2 }
  0x12   : > { %859 = vmatmul.mubr.msk.f32.vlgmr.msra.gmra.mrb[0].mxu0 %vm323_vm0, %v322_v7  ;;  %567 = vperm.xlu1 %901, %v319_v14   ;;  %s1044_s22 = scalar_lea.vmem %s1081_s8, %s872_s19 }
  0x13   : > { %641 = vmatprep.mubr.f32.mxu0 %v918_v5 }
  0x88   : > { %v417_v47 = vpop.permute.xlu0 %416 }
  0x89   : > { %v427_v57 = vpop.permute.xlu1 %426 }
  0x8c   : > { %v422_v52 = vpop.permute.xlu0 %421 }
  0x8d   : > { %v432_v9 = vpop.permute.xlu1 %431 }
  0xe5   : > { %v393_v15 = vpop.f32.mrb[0].mxu0 }
  0xe6   : > { %v398_v16 = vmul.f32 %v393_v15, %v393_v15  ;;  %v395_v17 = vpop.f32.mrb[1].mxu0 }
  0xe7   : > { %v399_v18 = vmul.f32 %v395_v17, %v395_v17 }
  0xe8   : > { %v400_v19 = vrot.slane %v398_v16, 4 }
  0xe9   : > { %v406_v21 = vrot.slane %v399_v18, 4  ;;  %447 = vmatprep.subr.mxu1 %v399_v18 }
  0xea   : > { %v401_v22 = vadd.f32 %v400_v19, %v398_v16  ;;  %448 = vmatpush1.msra.mxu1 %v398_v16 }
  0xeb   : > { %v407_v23 = vadd.f32 %v406_v21, %v399_v18  ;;  %860 = vmatmul.mubr.msk.f32.vlgmr.msra.gmra.mrb[0].mxu1 %vm434_vm1, %v308_v20 }
  0xec   : > { %v402_v24 = vrot.slane %v401_v22, 2  ;;  %517 = vmatprep.mubr.f32.mxu1 %v918_v5 }
  0xed   : > { %v408_v26 = vrot.slane %v407_v23, 2 }
  0xee   : > { %v403_v30 = vadd.f32 %v402_v24, %v401_v22  ;;  %v316_v24 = vld [vmem:[%s1077_s4] sm:$0xff] }
  0xef   : > { %v409_v31 = vadd.f32 %v408_v26, %v407_v23  ;;  %861 = vmatmul.mubr.msk.f32.gmra.mrb[2].mxu1 %vm434_vm1, %v309_v25  ;;  %v317_v25 = vld [vmem:[%s1077_s4 + $0x8] sm:$0xff]  ;;  %v563_v26 = vpop.permute.xlu0 %562 }
  0xf0   : > { %v404_v32 = vrot.slane %v403_v30, 1  ;;  %523 = vmatprep.mubr.f32.mxu1 %v918_v5 }
  0xf1   : > { %v410_v34 = vrot.slane %v409_v31, 1 }
  0xf2   : > { %v405_v37 = vadd.f32 %v404_v32, %v403_v30 }
  0xf3   : > { %v411_v38 = vadd.f32 %v410_v34, %v409_v31  ;;  %862 = vmatmul.mubr.msk.f32.gmra.mrb[4].mxu1 %vm434_vm1, %v310_v33  ;;  %v568_v31 = vpop.permute.xlu1 %567 }
  0xf4   : > { %v412_v39 = vsub.f32 0.0, %v405_v37  ;;  %529 = vmatprep.mubr.f32.mxu1 %v918_v5 }
  0xf5   : > { %v413_v41 = vsub.f32 0.0, %v411_v38 }
  0xf7   : > { %v778_v43 = vcombine.low %v412_v39, %v413_v41  ;;  %863 = vmatmul.mubr.msk.f32.gmra.mrb[6].mxu1 %vm434_vm1, %v311_v40 }
  0xf8   : > { %734 = vmatprep.mubr.f32.mxu1 %v918_v5 }
  0xf9   : > { %v785_v44 = vrot.slane %v778_v43, %v1035_v42 }
  0xfb   : > { %v792_v46 = vrot.slane %v785_v44, %v1035_v42 }
  0xfd   : > { %869 = vst.msk [vmem:[%s1044_s22 + $0x1] ss:$2 sm:$0x3] %vm1046_vm2, %v792_v46 }
 0x1be   : > { %v513_v48 = vpop.f32.mrb[0].mxu1 }
 0x1bf   : > { %v514_v49 = vadd.f32 %v513_v48, %v417_v47  ;;  %v515_v50 = vpop.f32.mrb[1].mxu1  ;;  %v666_v48 = vstv %s321_s28 }
 0x1c0   : > { %v516_v51 = vadd.f32 %v515_v50, %v417_v47  ;;  %v320_v47 = vld [vmem:[%s1079_s6] sm:$0x1] }
 0x1c1   : > { %v544_v54 = vmul.f32 0.01, %v514_v49  ;;  %vm536_vm3 = vcmp.ge.f32.partialorder %v514_v49, 0.0 }
 0x1c2   : > { %v519_v53 = vpop.f32.mrb[2].mxu1  ;;  %v545_v58 = vmul.f32 0.01, %v516_v51  ;;  %vm537_vm4 = vcmp.ge.f32.partialorder %v516_v51, 0.0 }
 0x1c3   : > { %v520_v55 = vadd.f32 %v519_v53, %v422_v52  ;;  %v521_v56 = vpop.f32.mrb[3].mxu1  ;;  %v552_v63 = vsel %vm536_vm3, %v514_v49, %v544_v54 }
 0x1c4   : > { %v522_v59 = vadd.f32 %v521_v56, %v422_v52  ;;  %v553_v6 = vsel %vm537_vm4, %v516_v51, %v545_v58 }
 0x1c5   : > { %vm538_vm5 = vcmp.ge.f32.partialorder %v520_v55, 0.0  ;;  %v546_v60 = vmul.f32 0.01, %v520_v55 }
 0x1c6   : > { %vm539_vm6 = vcmp.ge.f32.partialorder %v522_v59, 0.0  ;;  %v547_v61 = vmul.f32 0.01, %v522_v59  ;;  %v525_v62 = vpop.f32.mrb[4].mxu1 }
 0x1c7   : > { %v554_v0 = vsel %vm538_vm5, %v520_v55, %v546_v60  ;;  %v526_v1 = vadd.f32 %v525_v62, %v427_v57  ;;  %v527_v2 = vpop.f32.mrb[5].mxu1 }
 0x1c8   : > { %v879_v3 = vpack.c.bf16 %v554_v0, %v552_v63  ;;  %v528_v4 = vadd.f32 %v527_v2, %v427_v57  ;;  %v555_v7 = vsel %vm539_vm6, %v522_v59, %v547_v61 }
 0x1c9   : > { %v877_v8 = vpack.c.bf16 %v555_v7, %v553_v6  ;;  %v548_v11 = vmul.f32 0.01, %v526_v1  ;;  %vm540_vm7 = vcmp.ge.f32.partialorder %v526_v1, 0.0 }
 0x1ca   : > { %v531_v10 = vpop.f32.mrb[6].mxu1  ;;  %v549_v14 = vmul.f32 0.01, %v528_v4  ;;  %vm541_vm8 = vcmp.ge.f32.partialorder %v528_v4, 0.0 }
 0x1cb   : > { %v532_v12 = vadd.f32 %v531_v10, %v432_v9  ;;  %v533_v13 = vpop.f32.mrb[7].mxu1  ;;  %878 = vmatprep.subr.bf16.mxu0 %v877_v8  ;;  %v556_v18 = vsel %vm540_vm7, %v526_v1, %v548_v11 }
 0x1cc   : > { %v534_v15 = vadd.f32 %v533_v13, %v432_v9  ;;  %880 = vmatpush1.bf16.msra.mxu0 %v879_v3  ;;  %v557_v21 = vsel %vm541_vm8, %v528_v4, %v549_v14 }
 0x1cd   : > { %vm542_vm9 = vcmp.ge.f32.partialorder %v532_v12, 0.0  ;;  %v550_v16 = vmul.f32 0.01, %v532_v12 }
 0x1ce   : > { %vm543_vm10 = vcmp.ge.f32.partialorder %v534_v15, 0.0  ;;  %v551_v17 = vmul.f32 0.01, %v534_v15 }
 0x1cf   : > { %v558_v19 = vsel %vm542_vm9, %v532_v12, %v550_v16 }
 0x1d0   : > { %v883_v20 = vpack.c.bf16 %v558_v19, %v556_v18  ;;  %v559_v22 = vsel %vm543_vm10, %v534_v15, %v551_v17 }
 0x1d1   : > { %v881_v23 = vpack.c.bf16 %v559_v22, %v557_v21 }
 0x1d3   : > { %882 = vmatprep.subr.bf16.mxu0 %v881_v23 }
 0x1d4   : > { %884 = vmatpush1.bf16.msra.mxu0 %v883_v20 }
 0x1d7   : > { %864 = vmatmul.mubr.msk.f32.vlgmr.msra.gmra.mrb[2].mxu0 %vm570_vm11, %v316_v24 }
 0x1d8   : > { %647 = vmatprep.mubr.f32.mxu0 %v918_v5 }
 0x1db   : > { %865 = vmatmul.mubr.msk.f32.gmra.mrb[4].mxu0 %vm570_vm11, %v317_v25 }
 0x2aa   : > { %v643_v27 = vpop.f32.mrb[2].mxu0 }
 0x2ab   : > { %v644_v28 = vadd.f32 %v643_v27, %v563_v26  ;;  %v645_v29 = vpop.f32.mrb[3].mxu0 }
 0x2ac   : > { %v646_v30 = vadd.f32 %v645_v29, %v563_v26 }
 0x2ad   : > { %v658_v33 = vmul.f32 0.01, %v644_v28  ;;  %vm654_vm12 = vcmp.ge.f32.partialorder %v644_v28, 0.0 }
 0x2ae   : > { %v649_v32 = vpop.f32.mrb[4].mxu0  ;;  %v659_v36 = vmul.f32 0.01, %v646_v30  ;;  %vm655_vm13 = vcmp.ge.f32.partialorder %v646_v30, 0.0 }
 0x2af   : > { %v650_v34 = vadd.f32 %v649_v32, %v568_v31  ;;  %v651_v35 = vpop.f32.mrb[5].mxu0  ;;  %v662_v39 = vsel %vm654_vm12, %v644_v28, %v658_v33 }
 0x2b0   : > { %v652_v37 = vadd.f32 %v651_v35, %v568_v31  ;;  %v663_v43 = vsel %vm655_vm13, %v646_v30, %v659_v36 }
 0x2b1   : > { %vm656_vm14 = vcmp.ge.f32.partialorder %v650_v34, 0.0  ;;  %v660_v5 = vmul.f32 0.01, %v650_v34 }
 0x2b2   : > { %vm657_vm15 = vcmp.ge.f32.partialorder %v652_v37, 0.0  ;;  %v661_v38 = vmul.f32 0.01, %v652_v37 }
 0x2b3   : > { %v664_v40 = vsel %vm656_vm14, %v650_v34, %v660_v5 }
 0x2b4   : > { %v887_v41 = vpack.c.bf16 %v664_v40, %v662_v39  ;;  %v665_v44 = vsel %vm657_vm15, %v652_v37, %v661_v38 }
 0x2b5   : > { %v885_v46 = vpack.c.bf16 %v665_v44, %v663_v43 }
 0x2b7   : > { %886 = vmatprep.subr.bf16.mxu1 %v885_v46 }
 0x2b8   : > { %888 = vmatpush1.bf16.msra.mxu1 %v887_v41 }
 0x2bb   : > { %866 = vmatmul.mubr.msk.f32.vlgmr.msra.gmra.mrb[8].mxu1 %vm323_vm0, %v320_v47 }
 0x38e   : > { %v736_v49 = vpop.f32.mrb[8].mxu1 }
 0x38f   : > { %v737_v50 = vadd.f32 %v736_v49, %v666_v48  ;;  %v738_v51 = vpop.f32.mrb[9].mxu1 }
 0x390   : > { %v739_v52 = vadd.f32 %v738_v51, %v666_v48 }
 0x391   : > { %v867_v53 = vmul.f32 -1.442695, %v737_v50 }
 0x392   : > { %v868_v54 = vmul.f32 -1.442695, %v739_v52 }
 0x393   : > { %902 = vpow2.f32 %v867_v53 }
 0x394   : > { %904 = vpow2.f32 %v868_v54 }
 0x39d   : > { %v903_v55 = vpop.eup %902 }
 0x39e   : > { %v905_v56 = vpop.eup %904  ;;  %v747_v57 = vadd.f32 1.0, %v903_v55 }
 0x39f   : > { %v748_v58 = vadd.f32 1.0, %v905_v56 }
 0x3a0   : > { %906 = vrcp.f32 %v747_v57 }
 0x3a1   : > { %908 = vrcp.f32 %v748_v58 }
 0x3aa   : > { %v907_v59 = vpop.eup %906 }
 0x3ab   : > { %v909_v60 = vpop.eup %908 }
 0x3ac   : > { %v755_v61 = vcombine.low %v907_v59, %v909_v60 }
 0x3ae   : > { %v762_v62 = vrot.slane %v755_v61, %v1035_v42 }
 0x3b0   : > { %v769_v63 = vrot.slane %v762_v62, %v1035_v42 }
 0x3b2   : > { %775 = vst.msk [vmem:[%s1044_s22] ss:$2 sm:$0x3] %vm1046_vm2, %v769_v63 }
 0x3b3 PF: > { %s19_s29 = sadd.s32 1, %s916_s29  }
 0x3b4   : > { %p16_p4 = scmp.ge.s32.totalorder %s19_s29, 4  }
 0x3b6   :  { %18 = sbr.rel (!%p16_p4) target bundleno = 2 (0x2), region = 83 }

</bundles_post_ra>
